<compile_context>
chip_gen: v7x
topology: tpu7x:2x2x1
jax: 0.10.0
libtpu: 0.0.40
codegen_flags: <defaults>
</compile_context>

<pallas_src>
import jax
import jax.numpy as jnp
from jax.experimental import pallas as pl
from jax.experimental.pallas import tpu as pltpu

_MAX_TILE_B = 32768  # lanes per grid step; multiple of 128; ~4-5 MiB live VMEM


def critic_kernel(x_ref, p_ref, b2_ref, out_ref):
    # x:   (S, TB)   batch on the lane axis
    # p:   (H, S+2)  packed resident params [ w1 | b1 | w2 ]
    # b2:  SMEM (1,) scalar bias
    # out: (1, TB)   lane-dense output slab
    S = x_ref.shape[0]
    w1 = p_ref[:, :S]            # (H, S)
    b1 = p_ref[:, S:S + 1]       # (H, 1)
    w2 = p_ref[:, S + 1:S + 2]   # (H, 1)

    # fc1 on the MXU (K = S, M = H, N = TB), bias + ReLU on the VPU.
    h = jnp.dot(w1, x_ref[...], preferred_element_type=jnp.float32)
    h = jnp.maximum(h + b1, 0.0)                                   # (H, TB)

    # output layer: single useful output column -> VPU multiply + XLU
    # sublane-reduce instead of an MXU matmul with a 1-wide RHS.
    v = jnp.sum(h * w2, axis=0, keepdims=True) + b2_ref[0]         # (1, TB)
    out_ref[...] = v.astype(out_ref.dtype)


def _round_up(n, m):
    return ((n + m - 1) // m) * m


def _choose_tile(B):
    if B <= 256:
        # Tiny batch: one full-extent block (no 128-divisibility requirement).
        return B, 1
    # >=2 grid steps so the "parallel" batch axis can shard across v7x's two
    # TensorCores; capped at _MAX_TILE_B; multiple of 128 so the trailing
    # partial block satisfies the lane-tiling rule.
    tb = min(_MAX_TILE_B, _round_up(pl.cdiv(B, 2), 128))
    return tb, pl.cdiv(B, tb)


def critic_net_forward_feature_major(xT, w1, b1, w2, b2):
    """Core entry point. xT: (state_dim, B) f32 -> (1, B) f32 lane-dense slab.

    Preferred in training loops: store the rollout buffer feature-major so the
    pallas_call is the only HBM pass over the activations.
    """
    S, B = xT.shape
    H = w1.shape[0]

    # Pack the three resident parameter tensors into one (H, S+2) slab:
    # one DMA stream / BlockSpec / per-step bookkeeping instead of three.
    params = jnp.concatenate([w1, b1, w2], axis=1)  # (H, S+2), ~480 bytes

    tb, n_blocks = _choose_tile(B)

    out = pl.pallas_call(
        critic_kernel,
        out_shape=jax.ShapeDtypeStruct((1, B), jnp.float32),
        grid=(n_blocks,),
        in_specs=[
            # x tile marches over the batch; trailing partial block is padded
            # by Pallas (garbage lanes -> garbage output lanes, clipped below).
            # (If DMA is ever exposed with very short grids, a Buffered(3)
            # pipeline_mode here is a marginal follow-up.)
            pl.BlockSpec((S, tb), lambda i: (0, i)),
            # packed [w1 | b1 | w2], resident across all grid steps
            pl.BlockSpec((H, S + 2), lambda i: (0, 0)),
            # b2 scalar via SMEM (no padded VMEM tile for a single float)
            pl.BlockSpec(memory_space=pltpu.MemorySpace.SMEM),
        ],
        # lane-dense output slab; edge block is clipped on writeback.
        out_specs=pl.BlockSpec((1, tb), lambda i: (0, i)),
        compiler_params=pltpu.CompilerParams(
            # batch axis is embarrassingly parallel -> shard across TCs on v7x
            dimension_semantics=("parallel",),
            # no vmem_limit_bytes: live usage (~4-5 MiB at tb=32768) is well
            # under the smallest default scoped limit (v5e: 16 MiB).
        ),
        cost_estimate=pl.CostEstimate(
            flops=2 * B * H * (S + 2),
            transcendentals=0,
            bytes_accessed=4 * (B * S + B + H * (S + 2) + 1),
        ),
    )(xT, params, b2)
    return out  # (1, B)


def critic_net_forward(x, w1, b1, w2, b2):
    """PyTorch-compatible wrapper. x: (B, state_dim) f32 -> (B, 1) f32.

    The x.T here is an extra HBM pass over the activations; in a real training
    loop keep the rollout buffer feature-major and call
    critic_net_forward_feature_major directly.
    """
    B = x.shape[0]
    out = critic_net_forward_feature_major(x.T, w1, b1, w2, b2)
    # Restore PyTorch's (B, 1) output shape outside the kernel (layout only).
    return out.reshape(B, 1)


def init_params(key, state_dim, hidden=20):
    """Deterministic init mimicking PyTorch nn.Linear default
    (uniform(-1/sqrt(fan_in), 1/sqrt(fan_in)))."""
    k1, k2, k3, k4 = jax.random.split(key, 4)
    bound1 = 1.0 / jnp.sqrt(jnp.float32(state_dim))
    bound2 = 1.0 / jnp.sqrt(jnp.float32(hidden))
    w1 = jax.random.uniform(k1, (hidden, state_dim), jnp.float32, -bound1, bound1)  # [out, in]
    b1 = jax.random.uniform(k2, (hidden, 1), jnp.float32, -bound1, bound1)
    w2 = jax.random.uniform(k3, (hidden, 1), jnp.float32, -bound2, bound2)          # output.weight.T
    b2 = jax.random.uniform(k4, (1,), jnp.float32, -bound2, bound2)
    return w1, b1, w2, b2


def reference_forward(x, w1, b1, w2, b2):
    """Plain-JAX reference, same math as the PyTorch forward."""
    h = jnp.maximum(x @ w1.T + b1.T, 0.0)   # (B, H)
    return h @ w2 + b2                      # (B, 1)


if __name__ == "__main__":
    key = jax.random.PRNGKey(0)
    k_x, k_x2, k_p = jax.random.split(key, 3)

    state_dim = 4   # CartPole-v0 observation dim
    batch = 8

    w1, b1, w2, b2 = init_params(k_p, state_dim)

    # Small case: single full-extent block.
    x = jax.random.normal(k_x, (batch, state_dim), dtype=jnp.float32)
    out = jax.block_until_ready(critic_net_forward(x, w1, b1, w2, b2))
    ref = reference_forward(x, w1, b1, w2, b2)
    assert out.shape == (batch, 1)
    assert jnp.allclose(out, ref, atol=1e-5), "mismatch vs reference (small batch)"

    # Gridded case: 300 -> 2 x 256-lane tiles with a partial trailing block.
    # Exercises the multi-step grid (>=2 steps for v7x's 2 TCs) + block clipping
    # with no wrapper-side padding pass.
    big_batch = 300
    x2 = jax.random.normal(k_x2, (big_batch, state_dim), dtype=jnp.float32)
    out2 = jax.block_until_ready(critic_net_forward(x2, w1, b1, w2, b2))
    ref2 = reference_forward(x2, w1, b1, w2, b2)
    assert out2.shape == (big_batch, 1)
    assert jnp.allclose(out2, ref2, atol=1e-5), "mismatch vs reference (gridded batch)"

    # Feature-major entry point (preferred path: no extra transpose pass over x).
    out3 = jax.block_until_ready(
        critic_net_forward_feature_major(x2.T, w1, b1, w2, b2))
    assert out3.shape == (1, big_batch)
    assert jnp.allclose(out3.reshape(-1, 1), ref2, atol=1e-5), \
        "mismatch vs reference (feature-major path)"

    print("KERNEL_OK")
</pallas_src>

<mosaic_0001>
module attributes {stable_mosaic.version = 11 : i64} {
  func.func @critic_kernel(%arg0: i32, %arg1: memref<4x8xf32, #tpu.memory_space<vmem>>, %arg2: memref<20x6xf32, #tpu.memory_space<vmem>>, %arg3: memref<1xf32, #tpu.memory_space<smem>>, %arg4: memref<1x8xf32, #tpu.memory_space<vmem>>) attributes {dimension_semantics = [#tpu.dimension_semantics<parallel>], iteration_bounds = array<i64: 1>, scalar_prefetch = 0 : i64, scratch_operands = 0 : i64, tpu.core_type = #tpu.core_type<tc>, window_params = [{transform_indices = @transform_0, window_bounds = array<i64: 4, 8>}, {pipeline_mode = #tpu.pipeline_mode<synchronous>, transform_indices = @transform_1, window_bounds = array<i64: 20, 6>}, {transform_indices = @transform_2, window_bounds = array<i64: 1>}, {transform_indices = @transform_3, window_bounds = array<i64: 1, 8>}]} {
    %c0 = arith.constant 0 : index
    %c0_0 = arith.constant 0 : index
    %0 = vector.load %arg2[%c0, %c0_0] : memref<20x6xf32, #tpu.memory_space<vmem>>, vector<20x4xf32>
    %c0_1 = arith.constant 0 : index
    %c4 = arith.constant 4 : index
    %1 = vector.load %arg2[%c0_1, %c4] : memref<20x6xf32, #tpu.memory_space<vmem>>, vector<20x1xf32>
    %c0_2 = arith.constant 0 : index
    %c5 = arith.constant 5 : index
    %2 = vector.load %arg2[%c0_2, %c5] : memref<20x6xf32, #tpu.memory_space<vmem>>, vector<20x1xf32>
    %c0_3 = arith.constant 0 : index
    %c0_4 = arith.constant 0 : index
    %3 = vector.load %arg1[%c0_3, %c0_4] : memref<4x8xf32, #tpu.memory_space<vmem>>, vector<4x8xf32>
    %cst = arith.constant dense<0.000000e+00> : vector<20x8xf32>
    %4 = tpu.matmul %0, %3, %cst {dimension_numbers = #tpu.dot_dimension_numbers<[1], [0], [0], [1], [0, 0, 1, 1], [], []>} : vector<20x4xf32>, vector<4x8xf32>, vector<20x8xf32> -> vector<20x8xf32>
    %5 = vector.broadcast %1 : vector<20x1xf32> to vector<20x8xf32>
    %6 = arith.addf %4, %5 : vector<20x8xf32>
    %cst_5 = arith.constant 0.000000e+00 : f32
    %7 = vector.broadcast %cst_5 : f32 to vector<20x8xf32>
    %8 = arith.maximumf %6, %7 : vector<20x8xf32>
    %9 = vector.broadcast %2 : vector<20x1xf32> to vector<20x8xf32>
    %10 = arith.mulf %8, %9 : vector<20x8xf32>
    %cst_6 = arith.constant dense<0.000000e+00> : vector<8xf32>
    %11 = vector.multi_reduction <add>, %10, %cst_6 [0] : vector<20x8xf32> to vector<8xf32>
    %12 = vector.shape_cast %11 : vector<8xf32> to vector<1x8xf32>
    %c0_7 = arith.constant 0 : index
    %13 = memref.load %arg3[%c0_7] : memref<1xf32, #tpu.memory_space<smem>>
    %14 = vector.broadcast %13 : f32 to vector<1x8xf32>
    %15 = arith.addf %12, %14 : vector<1x8xf32>
    %c0_8 = arith.constant 0 : index
    %c0_9 = arith.constant 0 : index
    %16 = vector.load %arg4[%c0_8, %c0_9] : memref<1x8xf32, #tpu.memory_space<vmem>>, vector<1x8xf32>
    tpu.vector_store %arg4[%c0_8, %c0_9], %15 {strides = array<i32>} : memref<1x8xf32, #tpu.memory_space<vmem>>, vector<1x8xf32>,
    return
  }
  func.func @transform_0(%arg0: i32) -> (i32, i32) {
    %c0_i32 = arith.constant 0 : i32
    %c0_i32_0 = arith.constant 0 : i32
    return %c0_i32, %arg0 : i32, i32
  }
  func.func @transform_1(%arg0: i32) -> (i32, i32) {
    %c0_i32 = arith.constant 0 : i32
    %c0_i32_0 = arith.constant 0 : i32
    %c0_i32_1 = arith.constant 0 : i32
    return %c0_i32, %c0_i32_0 : i32, i32
  }
  func.func @transform_2(%arg0: i32) -> i32 {
    %c0_i32 = arith.constant 0 : i32
    %c0_i32_0 = arith.constant 0 : i32
    return %c0_i32 : i32
  }
  func.func @transform_3(%arg0: i32) -> (i32, i32) {
    %c0_i32 = arith.constant 0 : i32
    %c0_i32_0 = arith.constant 0 : i32
    return %c0_i32, %arg0 : i32, i32
  }
}

</mosaic_0001>

<bundles_post_ra>
// kernel: tpu_custom_call.1
= control target key start
LH: loop header
LB: loop body
LE: loop exit
PB: predicated region body
PF: predicated region fallthrough
CT: control target
= control target key end

     0   :  { %vm42_vm0 = vcmask 1043456   ;;  %v230_v1 = vmov 0.0   ;;  %vm35_vm1 = vcmask 31744   ;;  %s285_s0 = inlined_call_operand.vmem [shape: f32[4,8], index: 0, kind: input, shape index: {}]   ;;  %s286_s1 = inlined_call_operand.vmem [shape: f32[20,6], index: 1, kind: input, shape index: {}]   ;;  %s287_s2 = inlined_call_operand.<no memory space> [shape: f32[1], index: 2, kind: input, shape index: {}]   ;;  %s288_s3 = inlined_call_operand.hbm [shape: f32[1,8], index: 3, kind: output, shape index: {}]  }
   0x1   :  { %v19_v0 = vld [vmem:[%s285_s0] sm:$0xf]  ;;  %184 = vmatprep.subr.mxu0 %v230_v1  ;;  %195 = vmatprep.subr.mxu1 %v230_v1  ;;  %v17_v3 = vld [vmem:[%s286_s1 + $0x8] sm:$0xff] }
   0x2   :  { %v16_v2 = vld [vmem:[%s286_s1] sm:$0xff]  ;;  %185 = vmatpush3.msk.msra.mxu0 %vm42_vm0, %v19_v0  ;;  %196 = vmatpush3.msk.msra.mxu1 %vm42_vm0, %v19_v0 }
   0x3   :  { %9 = vsyncpa [#allocation4], 0  ;;  %vm231_vm2 = vmmov 0   ;;  %v18_v4 = vld [vmem:[%s286_s1 + $0x10] sm:$0xf]  ;;  %v232_v5 = vmov 4   ;;  %v158_v38 = vstv %s287_s2 }
   0x4   :  { %186 = vmatprep.mubr.msk.f32.mxu0 %vm231_vm2, %v230_v1  ;;  %189 = vmatprep.mubr.msk.f32.mxu1 %vm231_vm2, %v230_v1  ;;  %v233_v6 = vmov 5   ;;  %vm144_vm3 = vcmask 64512   ;;  %vm148_vm4 = vcmask 60416   ;;  %s234_s20 = smov [#allocation3]   ;;  %vm160_vm5 = vcmask 57344  }
   0x5   :  { %187 = vmatmul.mubr.msk.f32.vlgmr.msra.gmra.mrb[0].mxu0 %vm35_vm1, %v16_v2  ;;  %190 = vmatmul.mubr.msk.f32.vlgmr.msra.gmra.mrb[0].mxu1 %vm35_vm1, %v17_v3  ;;  %s168_s21 = sshll.u32 %s234_s20, 4  ;;  %s169_s21 = int_to_ptr.vmem [resolvable:$true] %s168_s21 }
   0x6   :  { %192 = vmatprep.mubr.msk.f32.mxu1 %vm231_vm2, %v230_v1  ;;  %202 = vset.pattern.permute.xlu0 %v232_v5  ;;  %s206_s22 = scalar_lea.vmem %s169_s21, 16  ;;  %s210_s23 = scalar_lea.vmem %s169_s21, 32 }
   0x7   :  { %22 = vperm.xlu0 %202, %v16_v2   ;;  %203 = vset.pattern.permute.xlu1 %v232_v5  ;;  %p207_p0 = scmp.ne.s32.totalorder %s169_s21, %s206_s22  ;;  %p211_p1 = scmp.lt.s32.totalorder %s169_s21, %s169_s21 }
   0x8   :  { %32 = vperm.xlu1 %203, %v18_v4   ;;  %p212_p2 = scmp.lt.s32.totalorder %s210_s23, %s206_s22 }
   0x9   :  { %193 = vmatmul.mubr.msk.f32.gmra.mrb[2].mxu1 %vm35_vm1, %v18_v4 }
   0xa   :  { %p213_p3 = por %p212_p2, %p211_p1 }
   0xb   :  { %27 = vperm.xlu0 %202, %v17_v3  }
   0xc   :  { %204 = vset.pattern.permute.xlu1 %v233_v6  ;;  %p214_p4 = pnand %p213_p3, %p207_p0 }
   0xd   :  { %130 = vperm.xlu1 %204, %v16_v2  }
   0xf   :  { %205 = vset.pattern.permute.xlu0 %v233_v6 }
  0x10   :  { %134 = vperm.xlu0 %205, %v17_v3  }
  0x11   :  { %138 = vperm.xlu1 %204, %v18_v4  }
  0x86   :  { %v23_v7 = vpop.permute.xlu0 %22 }
  0x87   :  { %v33_v8 = vpop.permute.xlu1 %32 }
  0x8a   :  { %v28_v9 = vpop.permute.xlu0 %27 }
  0x8c   :  { %v131_v16 = vpop.permute.xlu1 %130 }
  0x8f   :  { %v135_v17 = vpop.permute.xlu0 %134 }
  0x90   :  { %v139_v28 = vpop.permute.xlu1 %138 }
  0xd8   :  { %v117_v10 = vpop.f32.mrb[0].mxu1  ;;  %v112_v11 = vpop.f32.mrb[0].mxu0 }
  0xd9   :  { %v118_v12 = vadd.f32 %v117_v10, %v28_v9  ;;  %v113_v13 = vadd.f32 %v112_v11, %v23_v7  ;;  %v191_v14 = vpop.f32.mrb[1].mxu1  ;;  %v188_v15 = vpop.f32.mrb[1].mxu0 }
  0xdb   :  { %v127_v18 = vmax.f32 %v118_v12, 0.0  ;;  %v126_v19 = vmax.f32 %v113_v13, 0.0 }
  0xdc   :  { %v122_v20 = vpop.f32.mrb[2].mxu1 }
  0xdd   :  { %v141_v21 = vmul.f32 %v131_v16, %v126_v19  ;;  %v123_v22 = vadd.f32 %v122_v20, %v33_v8  ;;  %v142_v23 = vmul.f32 %v135_v17, %v127_v18  ;;  %v194_v24 = vpop.f32.mrb[3].mxu1 }
  0xdf   :  { %v128_v25 = vmax.f32 %v123_v22, 0.0  ;;  %v145_v26 = vsel %vm144_vm3, %v141_v21, 0.0  ;;  %v146_v27 = vsel %vm144_vm3, %v142_v23, 0.0 }
  0xe0   :  { %v147_v29 = vadd.f32 %v146_v27, %v145_v26 }
  0xe1   :  { %v143_v30 = vmul.f32 %v139_v28, %v128_v25 }
  0xe3   :  { %v149_v31 = vsel %vm148_vm4, %v143_v30, 0.0 }
  0xe4   :  { %v150_v32 = vadd.f32 %v149_v31, %v147_v29 }
  0xe6   :  { %v151_v33 = vrot.slane %v150_v32, 4 }
  0xe8   :  { %v152_v34 = vadd.f32 %v151_v33, %v150_v32 }
  0xea   :  { %v153_v35 = vrot.slane %v152_v34, 2 }
  0xec   :  { %v154_v36 = vadd.f32 %v153_v35, %v152_v34 }
  0xee   :  { %v155_v37 = vrot.slane %v154_v36, 1 }
  0xf0   :  { %v156_v39 = vadd.f32 %v155_v37, %v154_v36 }
  0xf2   :  { %v159_v40 = vadd.f32 %v158_v38, %v156_v39 }
  0xf4   :  { %161 = vst.msk [vmem:[#allocation3] sm:$0x1] %vm160_vm5, %v159_v40 }
  0xf5   :  { %217 = shalt.err (!%p214_p4)
}
  0xf6   :  { %s218_s26 = scalar_lea.hbm %s288_s3, 16 }
  0xf7   :  { %p219_p5 = scmp.ne.s32.totalorder %s288_s3, %s218_s26  ;;  %p222_p6 = scmp.lt.u32.totalorder %s218_s26, %s288_s3 }
  0xf9   :  { %p224_p7 = pnand %p222_p6, %p219_p5 }
  0xfb   :  { %227 = shalt.err (!%p224_p7)
}
  0xfc   :  { %171 = dma.vmem_to_hbm [thread:$0]  %s169_s21, 16, %s288_s3, [#allocation4]  }
  0xfd   :  { %228 = dma.done.wait [#allocation4], 16  }
  0xfe   :  { %229 = vsyncadd [#allocation4], 4294967280 }
  0xff   :  { %175 = vsyncpa [#allocation4], 1 }

</bundles_post_ra>
